<compile_context>
chip_gen: v5e
topology: v5e:2x2
jax: 0.10.0
libtpu: 0.0.40
codegen_flags: <defaults>
</compile_context>

<pallas_src>
import functools

import jax
import jax.numpy as jnp
import numpy as np
from jax.experimental import pallas as pl
from jax.experimental.pallas import tpu as pltpu


def _gfilm_kernel(g_ref, b_ref, x_ref, o_ref):
    """Streaming FiLM tile: out = g * x + b.

    g_ref : (Rt, 1)   per-(batch,channel) scale = 1 + gamma  (f32)
    b_ref : (Rt, 1)   per-(batch,channel) shift = beta       (f32)
    x_ref : (Rt, St)  feature-map tile (rows = batch*channel, cols = spatial)
    o_ref : (Rt, St)  output tile
    """
    o_ref[...] = (g_ref[...] * x_ref[...] + b_ref[...]).astype(o_ref.dtype)


def _round_down(v, m):
    return max(m, (v // m) * m)


def _pick_tiles(rows, spatial, itemsize):
    """Static tile sizes honoring the (8, 128) block constraint and VMEM."""
    # Row (sublane) tile: multiple of 8, or the full extent if not divisible.
    if rows % 8 == 0:
        r_tile = min(rows, 256)
    else:
        r_tile = rows
    # Spatial (lane) tile: multiple of 128, or the full extent if not divisible.
    if spatial % 128 == 0:
        # ~2 MiB per (r_tile, s_tile) block; x + out double-buffered -> ~8 MiB,
        # well under the scoped-VMEM default on v5e/v6e/v7x.
        budget = 2 * 1024 * 1024
        s_tile = min(spatial, _round_down(budget // (r_tile * itemsize), 128))
    else:
        s_tile = spatial
    return r_tile, s_tile


@functools.partial(jax.jit, static_argnames=("group",))
def gfilm_forward(conv_output, cla, wg, bg, wb, bb, *, group):
    """FiLM modulation.

    conv_output: Z2 -> (B, C, H, W);  C4 -> (B, C, 4, H, W)
    cla:         (B, P)
    wg, wb:      (C, P)   (PyTorch nn.Linear weight layout: [out, in])
    bg, bb:      (C,)
    """
    orig_shape = conv_output.shape
    if group == "Z2":
        B, C, H, W = orig_shape
        S = H * W
    elif group == "C4":
        B, C, G, H, W = orig_shape
        assert G == 4
        S = G * H * W
    else:
        raise ValueError(group)

    rows = B * C
    x2d = conv_output.reshape(rows, S)        # free reshape, no transpose

    # Tiny gamma/beta matmuls done once in plain JAX, in f32.
    gamma = jnp.dot(cla, wg.T, preferred_element_type=jnp.float32) \
        + bg.astype(jnp.float32)              # (B, C)
    beta = jnp.dot(cla, wb.T, preferred_element_type=jnp.float32) \
        + bb.astype(jnp.float32)              # (B, C)
    g1 = (1.0 + gamma).reshape(rows, 1)       # (B*C, 1) scale, f32
    b1 = beta.reshape(rows, 1)                # (B*C, 1) shift, f32

    itemsize = jnp.dtype(conv_output.dtype).itemsize
    r_tile, s_tile = _pick_tiles(rows, S, itemsize)

    out2d = pl.pallas_call(
        _gfilm_kernel,
        out_shape=jax.ShapeDtypeStruct((rows, S), conv_output.dtype),
        grid_spec=pltpu.PrefetchScalarGridSpec(
            num_scalar_prefetch=0,
            grid=(pl.cdiv(rows, r_tile), pl.cdiv(S, s_tile)),
            in_specs=[
                pl.BlockSpec((r_tile, 1), lambda r, s: (r, 0)),       # g
                pl.BlockSpec((r_tile, 1), lambda r, s: (r, 0)),       # b
                pl.BlockSpec((r_tile, s_tile), lambda r, s: (r, s)),  # x
            ],
            out_specs=pl.BlockSpec((r_tile, s_tile), lambda r, s: (r, s)),
        ),
        compiler_params=pltpu.CompilerParams(
            dimension_semantics=("parallel", "parallel")),
    )(g1, b1, x2d)

    return out2d.reshape(orig_shape)


def _reference(conv_output, cla, wg, bg, wb, bb, group):
    """Pure-JAX replica of the PyTorch forward (for correctness check)."""
    gamma = cla @ wg.T + bg        # (B, C)
    beta = cla @ wb.T + bb         # (B, C)
    if group == "Z2":
        g = gamma[:, :, None, None]
        b = beta[:, :, None, None]
    else:
        g = gamma[:, :, None, None, None]
        b = beta[:, :, None, None, None]
    return (1.0 + g) * conv_output + b


if __name__ == "__main__":
    key = jax.random.PRNGKey(0)
    k1, k2, k3, k4, k5, k6, k7 = jax.random.split(key, 7)

    B, C, H, W, P = 2, 4, 16, 16, 32

    # Deterministic "nn.Linear" parameters (weight: [out, in], bias: [out]).
    wg = jax.random.normal(k1, (C, P), jnp.float32) * 0.1
    bg = jax.random.normal(k2, (C,), jnp.float32) * 0.1
    wb = jax.random.normal(k3, (C, P), jnp.float32) * 0.1
    bb = jax.random.normal(k4, (C,), jnp.float32) * 0.1

    cla = jax.random.normal(k5, (B, P), jnp.float32)

    # Z2 case: [B, C, H, W]
    x_z2 = jax.random.normal(k6, (B, C, H, W), jnp.float32)
    out_z2 = jax.block_until_ready(
        gfilm_forward(x_z2, cla, wg, bg, wb, bb, group="Z2"))
    ref_z2 = _reference(x_z2, cla, wg, bg, wb, bb, "Z2")
    np.testing.assert_allclose(np.asarray(out_z2), np.asarray(ref_z2),
                               rtol=1e-5, atol=1e-5)

    # C4 case: [B, C, 4, H, W]
    x_c4 = jax.random.normal(k7, (B, C, 4, H, W), jnp.float32)
    out_c4 = jax.block_until_ready(
        gfilm_forward(x_c4, cla, wg, bg, wb, bb, group="C4"))
    ref_c4 = _reference(x_c4, cla, wg, bg, wb, bb, "C4")
    np.testing.assert_allclose(np.asarray(out_c4), np.asarray(ref_c4),
                               rtol=1e-5, atol=1e-5)

    print("KERNEL_OK")
</pallas_src>

<mosaic_0001>
module attributes {stable_mosaic.version = 11 : i64} {
  func.func @_gfilm_kernel(%arg0: i32, %arg1: i32, %arg2: memref<8x1xf32, #tpu.memory_space<vmem>>, %arg3: memref<8x1xf32, #tpu.memory_space<vmem>>, %arg4: memref<8x256xf32, #tpu.memory_space<vmem>>, %arg5: memref<8x256xf32, #tpu.memory_space<vmem>>) attributes {dimension_semantics = [#tpu.dimension_semantics<parallel>, #tpu.dimension_semantics<parallel>], iteration_bounds = array<i64: 1, 1>, scalar_prefetch = 0 : i64, scratch_operands = 0 : i64, tpu.core_type = #tpu.core_type<tc>, window_params = [{transform_indices = @transform_0, window_bounds = array<i64: 8, 1>}, {transform_indices = @transform_1, window_bounds = array<i64: 8, 1>}, {transform_indices = @transform_2, window_bounds = array<i64: 8, 256>}, {transform_indices = @transform_3, window_bounds = array<i64: 8, 256>}]} {
    %c0 = arith.constant 0 : index
    %c0_0 = arith.constant 0 : index
    %0 = vector.load %arg2[%c0, %c0_0] : memref<8x1xf32, #tpu.memory_space<vmem>>, vector<8x1xf32>
    %c0_1 = arith.constant 0 : index
    %c0_2 = arith.constant 0 : index
    %1 = vector.load %arg4[%c0_1, %c0_2] : memref<8x256xf32, #tpu.memory_space<vmem>>, vector<8x256xf32>
    %2 = vector.broadcast %0 : vector<8x1xf32> to vector<8x256xf32>
    %3 = arith.mulf %2, %1 : vector<8x256xf32>
    %c0_3 = arith.constant 0 : index
    %c0_4 = arith.constant 0 : index
    %4 = vector.load %arg3[%c0_3, %c0_4] : memref<8x1xf32, #tpu.memory_space<vmem>>, vector<8x1xf32>
    %5 = vector.broadcast %4 : vector<8x1xf32> to vector<8x256xf32>
    %6 = arith.addf %3, %5 : vector<8x256xf32>
    %c0_5 = arith.constant 0 : index
    %c0_6 = arith.constant 0 : index
    %7 = vector.load %arg5[%c0_5, %c0_6] : memref<8x256xf32, #tpu.memory_space<vmem>>, vector<8x256xf32>
    tpu.vector_store %arg5[%c0_5, %c0_6], %6 {strides = array<i32>} : memref<8x256xf32, #tpu.memory_space<vmem>>, vector<8x256xf32>,
    return
  }
  func.func @transform_0(%arg0: i32, %arg1: i32) -> (i32, i32) {
    %c0_i32 = arith.constant 0 : i32
    %c0_i32_0 = arith.constant 0 : i32
    return %arg0, %c0_i32 : i32, i32
  }
  func.func @transform_1(%arg0: i32, %arg1: i32) -> (i32, i32) {
    %c0_i32 = arith.constant 0 : i32
    %c0_i32_0 = arith.constant 0 : i32
    return %arg0, %c0_i32 : i32, i32
  }
  func.func @transform_2(%arg0: i32, %arg1: i32) -> (i32, i32) {
    %c0_i32 = arith.constant 0 : i32
    return %arg0, %arg1 : i32, i32
  }
  func.func @transform_3(%arg0: i32, %arg1: i32) -> (i32, i32) {
    %c0_i32 = arith.constant 0 : i32
    return %arg0, %arg1 : i32, i32
  }
}

</mosaic_0001>

<bundles_post_ra>
// kernel: gfilm_forward.1
= control target key start
LH: loop header
LB: loop body
LE: loop exit
PB: predicated region body
PF: predicated region fallthrough
CT: control target
= control target key end

     0   :  { %v40_v0 = vmov 0   ;;  %s79_s0 = inlined_call_operand.vmem [shape: f32[8,1], index: 0, kind: input, shape index: {}]   ;;  %s80_s1 = inlined_call_operand.vmem [shape: f32[8,1], index: 1, kind: input, shape index: {}]   ;;  %s81_s2 = inlined_call_operand.vmem [shape: f32[8,256], index: 2, kind: input, shape index: {}]   ;;  %s82_s3 = inlined_call_operand.vmem [shape: f32[8,256], index: 3, kind: output, shape index: {}]  }
   0x1   :  { %39 = vset.pattern.permute.xlu0 %v40_v0  ;;  %v14_v1 = vld [vmem:[%s79_s0] sm:$0xff]  ;;  %v16_v5 = vld [vmem:[%s81_s2 + $0x8] sm:$0xff] }
   0x2   :  { %19 = vperm.xlu0 %39, %v14_v1   ;;  %v24_v2 = vld [vmem:[%s80_s1] sm:$0xff] }
   0x3   :  { %v15_v4 = vld [vmem:[%s81_s2] sm:$0xff] }
   0xa   :  { %27 = vperm.xlu0 %39, %v24_v2  }
  0x74   :  { %v20_v3 = vpop.permute.xlu0 %19 }
  0x75   :  { %v22_v6 = vmul.f32 %v20_v3, %v15_v4  ;;  %v23_v7 = vmul.f32 %v20_v3, %v16_v5 }
  0x7c   :  { %v28_v8 = vpop.permute.xlu0 %27 }
  0x7d   :  { %v30_v9 = vadd.f32 %v28_v8, %v22_v6  ;;  %v31_v10 = vadd.f32 %v28_v8, %v23_v7 }
  0x7f   :  { %32 = vst [vmem:[%s82_s3] sm:$0xff] %v30_v9 }
  0x80   :  { %33 = vst [vmem:[%s82_s3 + $0x8] sm:$0xff] %v31_v10 }

</bundles_post_ra>
